<compile_context>
chip_gen: v7x
topology: tpu7x:2x2x1
jax: 0.10.0
libtpu: 0.0.40
codegen_flags: <defaults>
</compile_context>

<pallas_src>
import functools

import jax
import jax.numpy as jnp
from jax.experimental import pallas as pl
from jax.experimental.pallas import tpu as pltpu


# ----------------------------------------------------------------------------
# tiling helpers (all static Python ints)
# ----------------------------------------------------------------------------
def _round_up(x, m):
    return -(-x // m) * m


def _pick_m_tile(M):
    """Row tile for the GEMM / elementwise slabs."""
    Mp = _round_up(M, 8)
    if Mp <= 256:
        return Mp, Mp
    for tm in (256, 128, 64, 32, 16, 8):
        if Mp % tm == 0:
            return tm, Mp
    return Mp, Mp


def _pick_k_tile(K):
    """K tile: single step when the (padded) K fits comfortably, else 512/384/256/128."""
    Kp = _round_up(K, 128)
    if Kp <= 2048:
        return Kp, Kp
    for tk in (512, 384, 256, 128):
        if Kp % tk == 0:
            return tk, Kp
    return 128, Kp


# ----------------------------------------------------------------------------
# Pallas kernels
# ----------------------------------------------------------------------------
def _mm_bn_kernel(a_ref, b_ref, s_ref, c_ref, o_ref, acc_ref, *, relu):
    """out = (a @ b) * scale + bias, optional ReLU.  f32 accumulation, epilogue
    + store only on the last k-step."""
    @pl.when(pl.program_id(2) == 0)
    def _():
        acc_ref[...] = jnp.zeros_like(acc_ref)

    acc_ref[...] += jnp.dot(a_ref[...], b_ref[...],
                            preferred_element_type=jnp.float32)

    @pl.when(pl.program_id(2) == pl.num_programs(2) - 1)
    def _():
        y = acc_ref[...] * s_ref[...] + c_ref[...]
        if relu:
            y = jnp.maximum(y, 0.0)
        o_ref[...] = y.astype(o_ref.dtype)


def _mm_bn_res_kernel(a_ref, b_ref, s_ref, c_ref, r_ref, o_ref, acc_ref, *, relu):
    """out = relu((a @ b) * scale + bias + residual)  (fused bottleneck tail)."""
    @pl.when(pl.program_id(2) == 0)
    def _():
        acc_ref[...] = jnp.zeros_like(acc_ref)

    acc_ref[...] += jnp.dot(a_ref[...], b_ref[...],
                            preferred_element_type=jnp.float32)

    @pl.when(pl.program_id(2) == pl.num_programs(2) - 1)
    def _():
        y = acc_ref[...] * s_ref[...] + c_ref[...] + r_ref[...].astype(jnp.float32)
        if relu:
            y = jnp.maximum(y, 0.0)
        o_ref[...] = y.astype(o_ref.dtype)


def _max9_kernel(*refs):
    """Elementwise max over the 9 shifted-window slabs (all same [tm, C] block)."""
    o_ref = refs[-1]
    m = refs[0][...]
    for r in refs[1:-1]:
        m = jnp.maximum(m, r[...])
    o_ref[...] = m


def _avgpool_kernel(x_ref, o_ref):
    # x block: [N, HW, C] -> mean over spatial positions (in f32)
    o_ref[...] = jnp.mean(x_ref[...].astype(jnp.float32), axis=1)


# ----------------------------------------------------------------------------
# Pallas op wrappers
# ----------------------------------------------------------------------------
@functools.partial(jax.jit, static_argnames=("relu", "out_dtype"))
def matmul_bn(a, b, scale, bias, residual=None, *, relu=False,
              out_dtype=jnp.bfloat16):
    """[M, K] @ [K, N] on the MXU with fused per-column affine (+res) (+ReLU).

    a, b (and residual) are bf16; accumulation and the scale/bias math are f32.
    """
    M, K = a.shape
    _, N = b.shape
    tm, Mp = _pick_m_tile(M)
    tk, Kp = _pick_k_tile(K)
    Np = _round_up(N, 128)
    tn = 256 if Np % 256 == 0 else 128

    ap = a if (Mp == M and Kp == K) else jnp.pad(a, ((0, Mp - M), (0, Kp - K)))
    bp = b if (Kp == K and Np == N) else jnp.pad(b, ((0, Kp - K), (0, Np - N)))
    s = scale.reshape(1, N).astype(jnp.float32)
    c = bias.reshape(1, N).astype(jnp.float32)
    if Np != N:
        s = jnp.pad(s, ((0, 0), (0, Np - N)))
        c = jnp.pad(c, ((0, 0), (0, Np - N)))

    a_spec = pl.BlockSpec((tm, tk), lambda i, j, k: (i, k))
    b_spec = pl.BlockSpec((tk, tn), lambda i, j, k: (k, j))
    v_spec = pl.BlockSpec((1, tn), lambda i, j, k: (0, j))
    o_spec = pl.BlockSpec((tm, tn), lambda i, j, k: (i, j))

    bytes_accessed = (Mp * Kp * ap.dtype.itemsize + Kp * Np * bp.dtype.itemsize
                      + Mp * Np * jnp.dtype(out_dtype).itemsize)

    if residual is None:
        kernel = functools.partial(_mm_bn_kernel, relu=relu)
        in_specs = [a_spec, b_spec, v_spec, v_spec]
        args = (ap, bp, s, c)
    else:
        rp = residual if (Mp == M and Np == N) else \
            jnp.pad(residual, ((0, Mp - M), (0, Np - N)))
        kernel = functools.partial(_mm_bn_res_kernel, relu=relu)
        # residual block index ignores k -> DMA'd once per output tile
        in_specs = [a_spec, b_spec, v_spec, v_spec,
                    pl.BlockSpec((tm, tn), lambda i, j, k: (i, j))]
        args = (ap, bp, s, c, rp)
        bytes_accessed += Mp * Np * rp.dtype.itemsize

    out = pl.pallas_call(
        kernel,
        out_shape=jax.ShapeDtypeStruct((Mp, Np), out_dtype),
        grid_spec=pltpu.PrefetchScalarGridSpec(
            num_scalar_prefetch=0,
            grid=(Mp // tm, Np // tn, Kp // tk),
            in_specs=in_specs,
            out_specs=o_spec,
            scratch_shapes=[pltpu.VMEM((tm, tn), jnp.float32)]),
        compiler_params=pltpu.CompilerParams(
            dimension_semantics=("parallel", "parallel", "arbitrary"),
            vmem_limit_bytes=32 * 1024 * 1024),
        cost_estimate=pl.CostEstimate(flops=2 * Mp * Np * Kp,
                                      transcendentals=0,
                                      bytes_accessed=bytes_accessed),
    )(*args)
    return out[:M, :N]


@jax.jit
def _max9(*xs):
    """Elementwise max over 9 same-shape [M, C] slabs (no stacked HBM tensor)."""
    M, C = xs[0].shape
    Mp = _round_up(M, 8)
    if Mp != M:
        xs = tuple(jnp.pad(x, ((0, Mp - M), (0, 0))) for x in xs)
    tm = Mp
    if Mp > 1024:
        for t in (1024, 512, 256, 128, 64, 32, 16, 8):
            if Mp % t == 0:
                tm = t
                break
    out = pl.pallas_call(
        _max9_kernel,
        out_shape=jax.ShapeDtypeStruct((Mp, C), xs[0].dtype),
        grid=(Mp // tm,),
        in_specs=[pl.BlockSpec((tm, C), lambda i: (i, 0)) for _ in xs],
        out_specs=pl.BlockSpec((tm, C), lambda i: (i, 0)),
        compiler_params=pltpu.CompilerParams(
            dimension_semantics=("parallel",)),
    )(*xs)
    return out[:M]


@jax.jit
def global_avgpool(x):
    """x: [N, HW, C] -> [N, C] f32 (AdaptiveAvgPool2d((1,1)) + Flatten)."""
    N, HW, C = x.shape
    return pl.pallas_call(
        _avgpool_kernel,
        out_shape=jax.ShapeDtypeStruct((N, C), jnp.float32),
        grid=(1,),
        in_specs=[pl.BlockSpec((N, HW, C), lambda i: (0, 0, 0))],
        out_specs=pl.BlockSpec((N, C), lambda i: (0, 0)),
    )(x)


# ----------------------------------------------------------------------------
# conv / pool built on the Pallas kernels (bf16 patch extraction = XLA glue)
# ----------------------------------------------------------------------------
def conv2d_bn(x, w, scale, bias, stride, padding, *, relu, residual=None,
              out_dtype=jnp.bfloat16):
    """Conv(NHWC, bias-free) fused with eval-BN affine (+residual) (+ReLU)."""
    N, H, W, C = x.shape
    KH, KW, _, Cout = w.shape
    OH = (H + 2 * padding - KH) // stride + 1
    OW = (W + 2 * padding - KW) // stride + 1
    if KH == 1 and KW == 1 and padding == 0:
        xs = x if stride == 1 else x[:, ::stride, ::stride, :]
        a = xs.reshape(N * OH * OW, C)
    else:
        xp = jnp.pad(x, ((0, 0), (padding, padding), (padding, padding), (0, 0))) \
            if padding else x
        cols = [xp[:, kh:kh + stride * OH:stride, kw:kw + stride * OW:stride, :]
                for kh in range(KH) for kw in range(KW)]
        a = jnp.concatenate(cols, axis=-1).reshape(N * OH * OW, KH * KW * C)
    b = w.reshape(KH * KW * C, Cout)
    r2 = None if residual is None else residual.reshape(N * OH * OW, Cout)
    y = matmul_bn(a, b, scale, bias, residual=r2, relu=relu, out_dtype=out_dtype)
    return y.reshape(N, OH, OW, Cout)


def maxpool_3x3_s2(x):
    """MaxPool2d(kernel_size=3, stride=2, padding=1) on NHWC (bf16)."""
    N, H, W, C = x.shape
    k, s, p = 3, 2, 1
    OH = (H + 2 * p - k) // s + 1
    OW = (W + 2 * p - k) // s + 1
    xp = jnp.pad(x, ((0, 0), (p, p), (p, p), (0, 0)), constant_values=-jnp.inf)
    wins = [xp[:, kh:kh + s * OH:s, kw:kw + s * OW:s, :].reshape(N * OH * OW, C)
            for kh in range(k) for kw in range(k)]
    return _max9(*wins).reshape(N, OH, OW, C)


def _linear(x, wb, relu, out_dtype=jnp.bfloat16):
    """Linear + bias (+ReLU) via the fused matmul epilogue (scale = 1)."""
    w, b = wb
    ones = jnp.ones((w.shape[1],), jnp.float32)
    return matmul_bn(x, w, ones, b, relu=relu, out_dtype=out_dtype)


# ----------------------------------------------------------------------------
# deterministic parameter construction (synthetic; no checkpoint loading)
# ----------------------------------------------------------------------------
class _Init:
    def __init__(self, seed=0):
        self.key = jax.random.PRNGKey(seed)

    def _next(self):
        self.key, sub = jax.random.split(self.key)
        return sub

    def conv(self, kh, kw, cin, cout):
        fan_in = kh * kw * cin
        w = jax.random.normal(self._next(), (kh, kw, cin, cout),
                              jnp.float32) * (2.0 / fan_in) ** 0.5
        return w.astype(jnp.bfloat16)

    def bn(self, c):
        # eval-mode BatchNorm folded into per-channel scale/bias (kept in f32)
        gamma = 1.0 + 0.1 * jax.random.normal(self._next(), (c,), jnp.float32)
        beta = 0.1 * jax.random.normal(self._next(), (c,), jnp.float32)
        mean = 0.1 * jax.random.normal(self._next(), (c,), jnp.float32)
        var = 1.0 + 0.1 * jnp.abs(jax.random.normal(self._next(), (c,), jnp.float32))
        scale = gamma / jnp.sqrt(var + 1e-5)
        bias = beta - mean * scale
        return scale, bias

    def linear(self, cin, cout):
        bound = 1.0 / (cin ** 0.5)
        w = jax.random.uniform(self._next(), (cin, cout), jnp.float32, -bound, bound)
        b = jax.random.uniform(self._next(), (cout,), jnp.float32, -bound, bound)
        return w.astype(jnp.bfloat16), b


def build_params(num_classes=3, seed=0):
    ini = _Init(seed)
    p = {"conv1": ini.conv(7, 7, 3, 64), "bn1": ini.bn(64), "layers": []}
    inplanes = 64
    for planes, blocks, stride in [(64, 3, 1), (128, 4, 2), (256, 6, 2), (512, 3, 2)]:
        layer = []
        for bidx in range(blocks):
            s = stride if bidx == 0 else 1
            blk = {
                "conv1": ini.conv(1, 1, inplanes, planes), "bn1": ini.bn(planes),
                "conv2": ini.conv(3, 3, planes, planes), "bn2": ini.bn(planes),
                "conv3": ini.conv(1, 1, planes, planes * 4), "bn3": ini.bn(planes * 4),
            }
            if s != 1 or inplanes != planes * 4:
                blk["ds_conv"] = ini.conv(1, 1, inplanes, planes * 4)
                blk["ds_bn"] = ini.bn(planes * 4)
            layer.append(blk)
            inplanes = planes * 4
        p["layers"].append(layer)
    p["fc1"] = ini.linear(2048, 512)
    p["fc2"] = ini.linear(512, 128)
    p["fc3"] = ini.linear(128, 32)
    p["fc4"] = ini.linear(32, num_classes)
    return p


# ----------------------------------------------------------------------------
# forward pass
# ----------------------------------------------------------------------------
_LAYER_STRIDES = (1, 2, 2, 2)  # stride of the first bottleneck of each stage


def bottleneck(x, blk, stride):
    identity = x
    out = conv2d_bn(x, blk["conv1"], *blk["bn1"], 1, 0, relu=True)
    out = conv2d_bn(out, blk["conv2"], *blk["bn2"], stride, 1, relu=True)
    if "ds_conv" in blk:
        identity = conv2d_bn(x, blk["ds_conv"], *blk["ds_bn"], stride, 0, relu=False)
    # conv3 + bn3 + residual add + ReLU fused into one kernel
    out = conv2d_bn(out, blk["conv3"], *blk["bn3"], 1, 0, relu=True,
                    residual=identity)
    return out


def resnet50_forward(params, x_nchw):
    x = jnp.transpose(x_nchw, (0, 2, 3, 1)).astype(jnp.bfloat16)  # NCHW -> NHWC bf16
    # stem: conv7x7/s2 + BN + ReLU (fused), maxpool 3x3/s2
    x = conv2d_bn(x, params["conv1"], *params["bn1"], 2, 3, relu=True)
    x = maxpool_3x3_s2(x)
    # residual stages
    for li, layer in enumerate(params["layers"]):
        for bi, blk in enumerate(layer):
            stride = _LAYER_STRIDES[li] if bi == 0 else 1
            x = bottleneck(x, blk, stride)
    # global average pool + flatten -> [N, 2048]
    N, H, W, C = x.shape
    feat = global_avgpool(x.reshape(N, H * W, C)).astype(jnp.bfloat16)
    # custom head: Linear(2048,512)+ReLU+Dropout, Linear(512,128)+ReLU,
    #              Linear(128,32)+ReLU, Linear(32,num_classes)
    h = _linear(feat, params["fc1"], relu=True)
    # TODO(synk): nn.Dropout(0.5) is the identity in eval/inference mode; no mask applied.
    h = _linear(h, params["fc2"], relu=True)
    h = _linear(h, params["fc3"], relu=True)
    h = _linear(h, params["fc4"], relu=False, out_dtype=jnp.float32)
    return h


# ----------------------------------------------------------------------------
if __name__ == "__main__":
    params = build_params(num_classes=3, seed=0)
    x = jax.random.normal(jax.random.PRNGKey(0), (2, 3, 64, 64), jnp.float32)
    fwd = jax.jit(resnet50_forward)
    out = jax.block_until_ready(fwd(params, x))
    assert out.shape == (2, 3), out.shape
    assert bool(jnp.all(jnp.isfinite(out)))
    print("KERNEL_OK")
</pallas_src>

<mosaic_0001>
module attributes {stable_mosaic.version = 11 : i64} {
  func.func @_mm_bn_kernel(%arg0: i32, %arg1: i32, %arg2: i32, %arg3: memref<256x256xbf16, #tpu.memory_space<vmem>>, %arg4: memref<256x128xbf16, #tpu.memory_space<vmem>>, %arg5: memref<1x128xf32, #tpu.memory_space<vmem>>, %arg6: memref<1x128xf32, #tpu.memory_space<vmem>>, %arg7: memref<256x128xbf16, #tpu.memory_space<vmem>>, %arg8: memref<256x128xf32, #tpu.memory_space<vmem>>) attributes {dimension_semantics = [#tpu.dimension_semantics<parallel>, #tpu.dimension_semantics<parallel>, #tpu.dimension_semantics<arbitrary>], iteration_bounds = array<i64: 8, 1, 1>, scalar_prefetch = 0 : i64, scratch_operands = 1 : i64, tpu.core_type = #tpu.core_type<tc>, window_params = [{transform_indices = @transform_0, window_bounds = array<i64: 256, 256>}, {transform_indices = @transform_1, window_bounds = array<i64: 256, 128>}, {transform_indices = @transform_2, window_bounds = array<i64: 1, 128>}, {transform_indices = @transform_3, window_bounds = array<i64: 1, 128>}, {transform_indices = @transform_4, window_bounds = array<i64: 256, 128>}]} {
    %c0_i32 = arith.constant 0 : i32
    %0 = arith.cmpi eq, %arg2, %c0_i32 : i32
    %1 = arith.extui %0 : i1 to i32
    %c0_i32_0 = arith.constant 0 : i32
    %2 = arith.cmpi ne, %1, %c0_i32_0 : i32
    scf.if %2 {
      %cst_10 = arith.constant 0.000000e+00 : f32
      %12 = vector.broadcast %cst_10 : f32 to vector<256x128xf32>
      %c0_11 = arith.constant 0 : index
      %c0_12 = arith.constant 0 : index
      %13 = vector.load %arg8[%c0_11, %c0_12] : memref<256x128xf32, #tpu.memory_space<vmem>>, vector<256x128xf32>
      tpu.vector_store %arg8[%c0_11, %c0_12], %12 {strides = array<i32>} : memref<256x128xf32, #tpu.memory_space<vmem>>, vector<256x128xf32>,
    } else {
    }
    %c0 = arith.constant 0 : index
    %c0_1 = arith.constant 0 : index
    %3 = vector.load %arg8[%c0, %c0_1] : memref<256x128xf32, #tpu.memory_space<vmem>>, vector<256x128xf32>
    %c0_2 = arith.constant 0 : index
    %c0_3 = arith.constant 0 : index
    %4 = vector.load %arg3[%c0_2, %c0_3] : memref<256x256xbf16, #tpu.memory_space<vmem>>, vector<256x256xbf16>
    %c0_4 = arith.constant 0 : index
    %c0_5 = arith.constant 0 : index
    %5 = vector.load %arg4[%c0_4, %c0_5] : memref<256x128xbf16, #tpu.memory_space<vmem>>, vector<256x128xbf16>
    %cst = arith.constant dense<0.000000e+00> : vector<256x128xf32>
    %6 = tpu.matmul %4, %5, %cst {dimension_numbers = #tpu.dot_dimension_numbers<[1], [0], [0], [1], [0, 0, 1, 1], [], []>} : vector<256x256xbf16>, vector<256x128xbf16>, vector<256x128xf32> -> vector<256x128xf32>
    %7 = arith.addf %3, %6 : vector<256x128xf32>
    %c0_6 = arith.constant 0 : index
    %c0_7 = arith.constant 0 : index
    %8 = vector.load %arg8[%c0_6, %c0_7] : memref<256x128xf32, #tpu.memory_space<vmem>>, vector<256x128xf32>
    tpu.vector_store %arg8[%c0_6, %c0_7], %7 {strides = array<i32>} : memref<256x128xf32, #tpu.memory_space<vmem>>, vector<256x128xf32>,
    %c0_i32_8 = arith.constant 0 : i32
    %9 = arith.cmpi eq, %arg2, %c0_i32_8 : i32
    %10 = arith.extui %9 : i1 to i32
    %c0_i32_9 = arith.constant 0 : i32
    %11 = arith.cmpi ne, %10, %c0_i32_9 : i32
    scf.if %11 {
      %c0_10 = arith.constant 0 : index
      %c0_11 = arith.constant 0 : index
      %12 = vector.load %arg8[%c0_10, %c0_11] : memref<256x128xf32, #tpu.memory_space<vmem>>, vector<256x128xf32>
      %c0_12 = arith.constant 0 : index
      %c0_13 = arith.constant 0 : index
      %13 = vector.load %arg5[%c0_12, %c0_13] : memref<1x128xf32, #tpu.memory_space<vmem>>, vector<1x128xf32>
      %14 = vector.broadcast %13 : vector<1x128xf32> to vector<256x128xf32>
      %15 = arith.mulf %12, %14 : vector<256x128xf32>
      %c0_14 = arith.constant 0 : index
      %c0_15 = arith.constant 0 : index
      %16 = vector.load %arg6[%c0_14, %c0_15] : memref<1x128xf32, #tpu.memory_space<vmem>>, vector<1x128xf32>
      %17 = vector.broadcast %16 : vector<1x128xf32> to vector<256x128xf32>
      %18 = arith.addf %15, %17 : vector<256x128xf32>
      %cst_16 = arith.constant 0.000000e+00 : f32
      %19 = vector.broadcast %cst_16 : f32 to vector<256x128xf32>
      %20 = arith.maximumf %18, %19 : vector<256x128xf32>
      %21 = arith.truncf %20 : vector<256x128xf32> to vector<256x128xbf16>
      %c0_17 = arith.constant 0 : index
      %c0_18 = arith.constant 0 : index
      %22 = vector.load %arg7[%c0_17, %c0_18] : memref<256x128xbf16, #tpu.memory_space<vmem>>, vector<256x128xbf16>
      tpu.vector_store %arg7[%c0_17, %c0_18], %21 {strides = array<i32>} : memref<256x128xbf16, #tpu.memory_space<vmem>>, vector<256x128xbf16>,
    } else {
    }
    return
  }
  func.func @transform_0(%arg0: i32, %arg1: i32, %arg2: i32) -> (i32, i32) {
    %c0_i32 = arith.constant 0 : i32
    return %arg0, %arg2 : i32, i32
  }
  func.func @transform_1(%arg0: i32, %arg1: i32, %arg2: i32) -> (i32, i32) {
    %c0_i32 = arith.constant 0 : i32
    return %arg2, %arg1 : i32, i32
  }
  func.func @transform_2(%arg0: i32, %arg1: i32, %arg2: i32) -> (i32, i32) {
    %c0_i32 = arith.constant 0 : i32
    %c0_i32_0 = arith.constant 0 : i32
    return %c0_i32, %arg1 : i32, i32
  }
  func.func @transform_3(%arg0: i32, %arg1: i32, %arg2: i32) -> (i32, i32) {
    %c0_i32 = arith.constant 0 : i32
    %c0_i32_0 = arith.constant 0 : i32
    return %c0_i32, %arg1 : i32, i32
  }
  func.func @transform_4(%arg0: i32, %arg1: i32, %arg2: i32) -> (i32, i32) {
    %c0_i32 = arith.constant 0 : i32
    return %arg0, %arg1 : i32, i32
  }
}

</mosaic_0001>

<bundles_post_ra>
// kernel: matmul_bn.1
= control target key start
LH: loop header
LB: loop body
LE: loop exit
PB: predicated region body
PF: predicated region fallthrough
CT: control target
= control target key end

     0   :  { %s1843_s15 = smov 0   ;;  %s1845_s16 = smov 0   ;;  %s2054_s0 = inlined_call_operand.vmem [shape: bf16[2048,256], index: 0, kind: input, shape index: {}]   ;;  %s2055_s1 = inlined_call_operand.vmem [shape: bf16[256,128], index: 1, kind: input, shape index: {}]   ;;  %s2056_s2 = inlined_call_operand.vmem [shape: f32[1,128], index: 2, kind: input, shape index: {}]   ;;  %s2057_s3 = inlined_call_operand.vmem [shape: f32[1,128], index: 3, kind: input, shape index: {}]   ;;  %s2058_s4 = inlined_call_operand.vmem [shape: bf16[2048,128], index: 4, kind: output, shape index: {}]  }
   0x1   :  { %s1847_s17 = smov 0  }
   0x2 LB: > { %s33_s18 = sadd.s32 1, %s1812_s16  ;;  %p1360_p0 = scmp.ge.s32.totalorder %s1816_s17, 1  ;;  %s1816_s17 = sphi %s1847_s17, %s14_s17   ;;  %s1812_s16 = sphi %s1845_s16, %s2060_s16   ;;  %s1808_s15 = sphi %s1843_s15, %s2059_s15  }
   0x3   : > { %p35_p1 = scmp.ge.s32.totalorder %s33_s18, 8  ;;  %p224_p2 = scmp.lt.s32.totalorder %s1816_s17, 9 }
   0x5   : > { %s2062_s18 = smov (%p35_p1, %s33_s18), 0  ;;  %p225_p3 = pnand %p1360_p0, %p224_p2 }
   0x6   : > { %v1730_v0 = vld [vmem:[%s2055_s1 + $0x40] sm:$0xff] (!%p225_p3)   ;;  %s1361_s21 = sshll.u32 (!%p225_p3), %s1808_s15, 5  ;;  %v1732_v2 = vld [vmem:[%s2055_s1 + $0x48] sm:$0xff] (!%p225_p3)   ;;  %v1734_v4 = vld [vmem:[%s2055_s1 + $0x50] sm:$0xff] (!%p225_p3)  }
   0x7   : > { %228 = sbr.rel (%p225_p3) target bundleno = 322 (0x142), region = 36  ;;  %v1731_v1 = vld [vmem:[%s2055_s1] sm:$0xff] (!%p225_p3)   ;;  %1578 = vmatprep.subr.bf16.mxu0 (!%p225_p3), %v1730_v0  ;;  %1690 = vmatprep.subr.bf16.mxu1 (!%p225_p3), %v1730_v0  ;;  %v1733_v3 = vld [vmem:[%s2055_s1 + $0x8] sm:$0xff] (!%p225_p3)   ;;  %p274_p4 = scmp.lt.s32.totalorder (!%p225_p3), %s1361_s21, 255  ;;  %v1735_v5 = vld [vmem:[%s2055_s1 + $0x10] sm:$0xff] (!%p225_p3)  }
   0x8   : > { %1579 = vmatpush3.bf16.msra.mxu0 (!%p225_p3), %v1731_v1  ;;  %1698 = vmatpush3.bf16.msra.mxu1 (!%p225_p3), %v1731_v1  ;;  %v1736_v6 = vld [vmem:[%s2055_s1 + $0x58] sm:$0xff] (!%p225_p3)   ;;  %v1738_v8 = vld [vmem:[%s2055_s1 + $0x60] sm:$0xff] (!%p225_p3)   ;;  %v1740_v10 = vld [vmem:[%s2055_s1 + $0x68] sm:$0xff] (!%p225_p3)  }
   0x9   : > { %1580 = vmatprep.subr.bf16.mxu0 (!%p225_p3), %v1732_v2  ;;  %1691 = vmatprep.subr.bf16.mxu1 (!%p225_p3), %v1732_v2  ;;  %v1737_v7 = vld [vmem:[%s2055_s1 + $0x18] sm:$0xff] (!%p225_p3)   ;;  %v1739_v9 = vld [vmem:[%s2055_s1 + $0x20] sm:$0xff] (!%p225_p3)   ;;  %v1741_v13 = vld [vmem:[%s2055_s1 + $0x28] sm:$0xff] (!%p225_p3)  }
   0xa   : > { %v1742_v14 = vld [vmem:[%s2055_s1 + $0x70] sm:$0xff] (!%p225_p3)   ;;  %v1744_v16 = vld [vmem:[%s2055_s1 + $0x78] sm:$0xff] (!%p225_p3)   ;;  %v1952_v51 = vld [vmem:[%s2056_s2] ss:$0 sm:$0xff] (!%p225_p3) }
   0xb   : > { %v1743_v15 = vld [vmem:[%s2055_s1 + $0x30] sm:$0xff] (!%p225_p3)   ;;  %v1745_v17 = vld [vmem:[%s2055_s1 + $0x38] sm:$0xff] (!%p225_p3)   ;;  %v1957_v57 = vld [vmem:[%s2057_s3] ss:$0 sm:$0xff] (!%p225_p3) }
   0xc   : > { %1581 = vmatpush3.bf16.msra.mxu0 (!%p225_p3), %v1733_v3  ;;  %1699 = vmatpush3.bf16.msra.mxu1 (!%p225_p3), %v1733_v3 }
   0xd   : > { %1582 = vmatprep.subr.bf16.mxu0 (!%p225_p3), %v1734_v4  ;;  %1692 = vmatprep.subr.bf16.mxu1 (!%p225_p3), %v1734_v4 }
   0xe   : > { %s2064_s21 = smov (!%p274_p4, %s1361_s21), 255 }
   0xf   : > { %s1450_s10 = sshll.u32 %s2064_s21, 3  ;;  %s1365_s12 = sshll.u32 %s2064_s21, 2 }
  0x10   : > { %1583 = vmatpush3.bf16.msra.mxu0 %v1735_v5  ;;  %1700 = vmatpush3.bf16.msra.mxu1 %v1735_v5  ;;  %s1894_s15 = scalar_lea.vmem %s2054_s0, %s1450_s10  ;;  %s1971_s21 = scalar_lea.vmem %s2058_s4, %s1365_s12 }
  0x11   : > { %1584 = vmatprep.subr.bf16.mxu0 %v1736_v6  ;;  %1693 = vmatprep.subr.bf16.mxu1 %v1736_v6  ;;  %v1748_v11 = vld [vmem:[%s1894_s15 + $0x4] ss:$8 sps:$4 sm:$0xff]   ;;  %v1746_v18 = vld [vmem:[%s1894_s15] ss:$8 sps:$4 sm:$0xff]   ;;  %v1752_v20 = vld [vmem:[%s1894_s15 + $0x14] ss:$8 sps:$4 sm:$0xff]  }
  0x12   : > { %v1751_v12 = vld [vmem:[%s1894_s15 + $0x84] ss:$8 sps:$4 sm:$0xff]   ;;  %729 = vmatprep.mubr.bf16.mxu0 %v1748_v11  ;;  %v1749_v19 = vld [vmem:[%s1894_s15 + $0x80] ss:$8 sps:$4 sm:$0xff]   ;;  %v1754_v21 = vld [vmem:[%s1894_s15 + $0x94] ss:$8 sps:$4 sm:$0xff]  }
  0x13   : > { %793 = vmatprep.mubr.bf16.mxu1 %v1751_v12  ;;  %v1756_v22 = vld [vmem:[%s1894_s15 + $0x10] ss:$8 sps:$4 sm:$0xff]   ;;  %v1758_v24 = vld [vmem:[%s1894_s15 + $0x24] ss:$8 sps:$4 sm:$0xff]   ;;  %v1762_v26 = vld [vmem:[%s1894_s15 + $0x20] ss:$8 sps:$4 sm:$0xff]  }
  0x14   : > { %1585 = vmatpush3.bf16.msra.mxu0 %v1737_v7  ;;  %1701 = vmatpush3.bf16.msra.mxu1 %v1737_v7  ;;  %v1757_v23 = vld [vmem:[%s1894_s15 + $0x90] ss:$8 sps:$4 sm:$0xff]   ;;  %v1760_v25 = vld [vmem:[%s1894_s15 + $0xa4] ss:$8 sps:$4 sm:$0xff]   ;;  %v1763_v27 = vld [vmem:[%s1894_s15 + $0xa0] ss:$8 sps:$4 sm:$0xff]  }
  0x15   : > { %1586 = vmatprep.subr.bf16.mxu0 %v1738_v8  ;;  %1694 = vmatprep.subr.bf16.mxu1 %v1738_v8  ;;  %v1764_v28 = vld [vmem:[%s1894_s15 + $0x34] ss:$8 sps:$4 sm:$0xff]   ;;  %v1768_v30 = vld [vmem:[%s1894_s15 + $0x30] ss:$8 sps:$4 sm:$0xff]   ;;  %v1770_v32 = vld [vmem:[%s1894_s15 + $0x44] ss:$8 sps:$4 sm:$0xff]  }
  0x16   : > { %v1766_v29 = vld [vmem:[%s1894_s15 + $0xb4] ss:$8 sps:$4 sm:$0xff]   ;;  %v1769_v31 = vld [vmem:[%s1894_s15 + $0xb0] ss:$8 sps:$4 sm:$0xff]   ;;  %v1772_v33 = vld [vmem:[%s1894_s15 + $0xc4] ss:$8 sps:$4 sm:$0xff]  }
  0x17   : > { %v1774_v34 = vld [vmem:[%s1894_s15 + $0x40] ss:$8 sps:$4 sm:$0xff]   ;;  %v1776_v36 = vld [vmem:[%s1894_s15 + $0x54] ss:$8 sps:$4 sm:$0xff]   ;;  %v1780_v38 = vld [vmem:[%s1894_s15 + $0x50] ss:$8 sps:$4 sm:$0xff]  }
  0x18   : > { %1587 = vmatpush3.bf16.msra.mxu0 %v1739_v9  ;;  %1702 = vmatpush3.bf16.msra.mxu1 %v1739_v9  ;;  %v1775_v35 = vld [vmem:[%s1894_s15 + $0xc0] ss:$8 sps:$4 sm:$0xff]   ;;  %v1778_v37 = vld [vmem:[%s1894_s15 + $0xd4] ss:$8 sps:$4 sm:$0xff]   ;;  %v1781_v39 = vld [vmem:[%s1894_s15 + $0xd0] ss:$8 sps:$4 sm:$0xff]  }
  0x19   : > { %1588 = vmatprep.subr.bf16.mxu0 %v1740_v10  ;;  %1695 = vmatprep.subr.bf16.mxu1 %v1740_v10  ;;  %v1782_v40 = vld [vmem:[%s1894_s15 + $0x64] ss:$8 sps:$4 sm:$0xff]   ;;  %v1786_v42 = vld [vmem:[%s1894_s15 + $0x60] ss:$8 sps:$4 sm:$0xff]   ;;  %v1788_v44 = vld [vmem:[%s1894_s15 + $0x74] ss:$8 sps:$4 sm:$0xff]  }
  0x1a   : > { %v1784_v41 = vld [vmem:[%s1894_s15 + $0xe4] ss:$8 sps:$4 sm:$0xff]   ;;  %v1787_v43 = vld [vmem:[%s1894_s15 + $0xe0] ss:$8 sps:$4 sm:$0xff]   ;;  %v1790_v45 = vld [vmem:[%s1894_s15 + $0xf4] ss:$8 sps:$4 sm:$0xff]  }
  0x1b   : > { %v1792_v46 = vld [vmem:[%s1894_s15 + $0x70] ss:$8 sps:$4 sm:$0xff]  }
  0x1c   : > { %1589 = vmatpush3.bf16.msra.mxu0 %v1741_v13  ;;  %1703 = vmatpush3.bf16.msra.mxu1 %v1741_v13  ;;  %v1793_v47 = vld [vmem:[%s1894_s15 + $0xf0] ss:$8 sps:$4 sm:$0xff]  }
  0x1d   : > { %1590 = vmatprep.subr.bf16.mxu0 %v1742_v14  ;;  %1696 = vmatprep.subr.bf16.mxu1 %v1742_v14 }
  0x20   : > { %1591 = vmatpush3.bf16.msra.mxu0 %v1743_v15  ;;  %1704 = vmatpush3.bf16.msra.mxu1 %v1743_v15 }
  0x21   : > { %1592 = vmatprep.subr.bf16.mxu0 %v1744_v16  ;;  %1697 = vmatprep.subr.bf16.mxu1 %v1744_v16 }
  0x24   : > { %1593 = vmatpush3.bf16.msra.mxu0 %v1745_v17  ;;  %1705 = vmatpush3.bf16.msra.mxu1 %v1745_v17 }
  0x27   : > { %730 = vmatmul.mubr.bf16.vlgmr.msra.gmra.mrb[0].mxu0 %v1746_v18  ;;  %794 = vmatmul.mubr.bf16.vlgmr.msra.gmra.mrb[0].mxu1 %v1749_v19 }
  0x28   : > { %737 = vmatprep.mubr.bf16.mxu0 %v1752_v20  ;;  %801 = vmatprep.mubr.bf16.mxu1 %v1754_v21 }
  0x2f   : > { %738 = vmatmul.mubr.bf16.gmra.mrb[4].mxu0 %v1756_v22  ;;  %802 = vmatmul.mubr.bf16.gmra.mrb[4].mxu1 %v1757_v23 }
  0x30   : > { %745 = vmatprep.mubr.bf16.mxu0 %v1758_v24  ;;  %809 = vmatprep.mubr.bf16.mxu1 %v1760_v25 }
  0x37   : > { %746 = vmatmul.mubr.bf16.gmra.mrb[8].mxu0 %v1762_v26  ;;  %810 = vmatmul.mubr.bf16.gmra.mrb[8].mxu1 %v1763_v27 }
  0x38   : > { %753 = vmatprep.mubr.bf16.mxu0 %v1764_v28  ;;  %817 = vmatprep.mubr.bf16.mxu1 %v1766_v29 }
  0x3f   : > { %754 = vmatmul.mubr.bf16.gmra.mrb[12].mxu0 %v1768_v30  ;;  %818 = vmatmul.mubr.bf16.gmra.mrb[12].mxu1 %v1769_v31 }
  0x40   : > { %761 = vmatprep.mubr.bf16.mxu0 %v1770_v32  ;;  %825 = vmatprep.mubr.bf16.mxu1 %v1772_v33 }
  0x47   : > { %762 = vmatmul.mubr.bf16.gmra.mrb[16].mxu0 %v1774_v34  ;;  %826 = vmatmul.mubr.bf16.gmra.mrb[16].mxu1 %v1775_v35 }
  0x48   : > { %769 = vmatprep.mubr.bf16.mxu0 %v1776_v36  ;;  %833 = vmatprep.mubr.bf16.mxu1 %v1778_v37 }
  0x4f   : > { %770 = vmatmul.mubr.bf16.gmra.mrb[20].mxu0 %v1780_v38  ;;  %834 = vmatmul.mubr.bf16.gmra.mrb[20].mxu1 %v1781_v39 }
  0x50   : > { %777 = vmatprep.mubr.bf16.mxu0 %v1782_v40  ;;  %841 = vmatprep.mubr.bf16.mxu1 %v1784_v41 }
  0x57   : > { %778 = vmatmul.mubr.bf16.gmra.mrb[24].mxu0 %v1786_v42  ;;  %842 = vmatmul.mubr.bf16.gmra.mrb[24].mxu1 %v1787_v43 }
  0x58   : > { %785 = vmatprep.mubr.bf16.mxu0 %v1788_v44  ;;  %849 = vmatprep.mubr.bf16.mxu1 %v1790_v45 }
  0x5f   : > { %786 = vmatmul.mubr.bf16.gmra.mrb[28].mxu0 %v1792_v46  ;;  %850 = vmatmul.mubr.bf16.gmra.mrb[28].mxu1 %v1793_v47 }
  0xfa   : > { %v1594_v48 = vpop.f32.mrb[0].mxu0  ;;  %v1642_v49 = vpop.f32.mrb[0].mxu1 }
  0xfb   : > { %v1595_v50 = vpop.f32.mrb[1].mxu0  ;;  %v1643_v52 = vpop.f32.mrb[1].mxu1 }
  0xfc   : > { %v1596_v53 = vadd.f32 %v1595_v50, %v1594_v48  ;;  %v1644_v54 = vadd.f32 %v1643_v52, %v1642_v49  ;;  %v1597_v55 = vpop.f32.mrb[2].mxu0  ;;  %v1645_v56 = vpop.f32.mrb[2].mxu1 }
  0xfd   : > { %v1598_v58 = vpop.f32.mrb[3].mxu0  ;;  %v1646_v59 = vpop.f32.mrb[3].mxu1 }
  0xfe   : > { %v964_v60 = vmul.f32 %v1596_v53, %v1952_v51  ;;  %v980_v61 = vmul.f32 %v1644_v54, %v1952_v51  ;;  %v1599_v62 = vadd.f32 %v1598_v58, %v1597_v55  ;;  %v1647_v63 = vadd.f32 %v1646_v59, %v1645_v56 }
 0x100   : > { %v1003_v0 = vadd.f32 %v1957_v57, %v964_v60  ;;  %v1019_v1 = vadd.f32 %v1957_v57, %v980_v61  ;;  %v965_v2 = vmul.f32 %v1599_v62, %v1952_v51  ;;  %v981_v3 = vmul.f32 %v1647_v63, %v1952_v51 }
 0x102   : > { %v1004_v4 = vadd.f32 %v1957_v57, %v965_v2  ;;  %v1020_v5 = vadd.f32 %v1957_v57, %v981_v3  ;;  %v1600_v6 = vpop.f32.mrb[4].mxu0  ;;  %v1648_v7 = vpop.f32.mrb[4].mxu1  ;;  %v1035_v8 = vmax.f32 %v1003_v0, 0.0  ;;  %v1051_v9 = vmax.f32 %v1019_v1, 0.0 }
 0x103   : > { %v1601_v10 = vpop.f32.mrb[5].mxu0  ;;  %v1649_v11 = vpop.f32.mrb[5].mxu1 }
 0x104   : > { %v1036_v12 = vmax.f32 %v1004_v4, 0.0  ;;  %v1052_v13 = vmax.f32 %v1020_v5, 0.0  ;;  %v1602_v14 = vadd.f32 %v1601_v10, %v1600_v6  ;;  %v1650_v15 = vadd.f32 %v1649_v11, %v1648_v7  ;;  %v1603_v16 = vpop.f32.mrb[6].mxu0  ;;  %v1651_v17 = vpop.f32.mrb[6].mxu1 }
 0x105   : > { %v1604_v18 = vpop.f32.mrb[7].mxu0  ;;  %v1652_v19 = vpop.f32.mrb[7].mxu1 }
 0x106   : > { %v1486_v20 = vpack.c.bf16 %v1036_v12, %v1035_v8  ;;  %v1526_v21 = vpack.c.bf16 %v1052_v13, %v1051_v9  ;;  %v966_v22 = vmul.f32 %v1602_v14, %v1952_v51  ;;  %v982_v23 = vmul.f32 %v1650_v15, %v1952_v51 }
 0x107   : > { %v1605_v24 = vadd.f32 %v1604_v18, %v1603_v16  ;;  %v1653_v25 = vadd.f32 %v1652_v19, %v1651_v17 }
 0x108   : > { %1487 = vst [vmem:[%s1971_s21] sm:$0xff] %v1486_v20   ;;  %1570 = vst [vmem:[%s1971_s21 + $0x40] sm:$0xff] %v1526_v21   ;;  %v1005_v26 = vadd.f32 %v1957_v57, %v966_v22  ;;  %v1021_v27 = vadd.f32 %v1957_v57, %v982_v23 }
 0x109   : > { %v967_v28 = vmul.f32 %v1605_v24, %v1952_v51  ;;  %v983_v29 = vmul.f32 %v1653_v25, %v1952_v51 }
 0x10a   : > { %v1606_v30 = vpop.f32.mrb[8].mxu0  ;;  %v1654_v31 = vpop.f32.mrb[8].mxu1  ;;  %v1037_v40 = vmax.f32 %v1005_v26, 0.0  ;;  %v1053_v41 = vmax.f32 %v1021_v27, 0.0 }
 0x10b   : > { %v1006_v32 = vadd.f32 %v1957_v57, %v967_v28  ;;  %v1022_v33 = vadd.f32 %v1957_v57, %v983_v29  ;;  %v1607_v34 = vpop.f32.mrb[9].mxu0  ;;  %v1655_v35 = vpop.f32.mrb[9].mxu1 }
 0x10c   : > { %v1608_v36 = vadd.f32 %v1607_v34, %v1606_v30  ;;  %v1656_v37 = vadd.f32 %v1655_v35, %v1654_v31  ;;  %v1609_v38 = vpop.f32.mrb[10].mxu0  ;;  %v1657_v39 = vpop.f32.mrb[10].mxu1 }
 0x10d   : > { %v1038_v42 = vmax.f32 %v1006_v32, 0.0  ;;  %v1054_v43 = vmax.f32 %v1022_v33, 0.0  ;;  %v1610_v44 = vpop.f32.mrb[11].mxu0  ;;  %v1658_v45 = vpop.f32.mrb[11].mxu1 }
 0x10e   : > { %v968_v46 = vmul.f32 %v1608_v36, %v1952_v51  ;;  %v984_v47 = vmul.f32 %v1656_v37, %v1952_v51  ;;  %v1611_v48 = vadd.f32 %v1610_v44, %v1609_v38  ;;  %v1659_v49 = vadd.f32 %v1658_v45, %v1657_v39 }
 0x10f   : > { %v1491_v50 = vpack.c.bf16 %v1038_v42, %v1037_v40  ;;  %v1531_v52 = vpack.c.bf16 %v1054_v43, %v1053_v41 }
 0x110   : > { %v1007_v53 = vadd.f32 %v1957_v57, %v968_v46  ;;  %v1023_v54 = vadd.f32 %v1957_v57, %v984_v47  ;;  %v969_v55 = vmul.f32 %v1611_v48, %v1952_v51  ;;  %v985_v56 = vmul.f32 %v1659_v49, %v1952_v51 }
 0x111   : > { %1563 = vst [vmem:[%s1971_s21 + $0x8] sm:$0xff] %v1491_v50   ;;  %1571 = vst [vmem:[%s1971_s21 + $0x48] sm:$0xff] %v1531_v52  }
 0x112   : > { %v1008_v58 = vadd.f32 %v1957_v57, %v969_v55  ;;  %v1024_v59 = vadd.f32 %v1957_v57, %v985_v56  ;;  %v1612_v60 = vpop.f32.mrb[12].mxu0  ;;  %v1660_v61 = vpop.f32.mrb[12].mxu1  ;;  %v1039_v62 = vmax.f32 %v1007_v53, 0.0  ;;  %v1055_v63 = vmax.f32 %v1023_v54, 0.0 }
 0x113   : > { %v1613_v0 = vpop.f32.mrb[13].mxu0  ;;  %v1661_v1 = vpop.f32.mrb[13].mxu1 }
 0x114   : > { %v1040_v2 = vmax.f32 %v1008_v58, 0.0  ;;  %v1056_v3 = vmax.f32 %v1024_v59, 0.0  ;;  %v1614_v4 = vadd.f32 %v1613_v0, %v1612_v60  ;;  %v1662_v5 = vadd.f32 %v1661_v1, %v1660_v61  ;;  %v1615_v6 = vpop.f32.mrb[14].mxu0  ;;  %v1663_v7 = vpop.f32.mrb[14].mxu1 }
 0x115   : > { %v1616_v8 = vpop.f32.mrb[15].mxu0  ;;  %v1664_v9 = vpop.f32.mrb[15].mxu1 }
 0x116   : > { %v1496_v10 = vpack.c.bf16 %v1040_v2, %v1039_v62  ;;  %v1536_v11 = vpack.c.bf16 %v1056_v3, %v1055_v63  ;;  %v970_v12 = vmul.f32 %v1614_v4, %v1952_v51  ;;  %v986_v13 = vmul.f32 %v1662_v5, %v1952_v51 }
 0x117   : > { %v1617_v14 = vadd.f32 %v1616_v8, %v1615_v6  ;;  %v1665_v15 = vadd.f32 %v1664_v9, %v1663_v7 }
 0x118   : > { %1564 = vst [vmem:[%s1971_s21 + $0x10] sm:$0xff] %v1496_v10   ;;  %1572 = vst [vmem:[%s1971_s21 + $0x50] sm:$0xff] %v1536_v11   ;;  %v1009_v16 = vadd.f32 %v1957_v57, %v970_v12  ;;  %v1025_v17 = vadd.f32 %v1957_v57, %v986_v13 }
 0x119   : > { %v971_v18 = vmul.f32 %v1617_v14, %v1952_v51  ;;  %v987_v19 = vmul.f32 %v1665_v15, %v1952_v51 }
 0x11a   : > { %v1618_v20 = vpop.f32.mrb[16].mxu0  ;;  %v1666_v21 = vpop.f32.mrb[16].mxu1  ;;  %v1041_v30 = vmax.f32 %v1009_v16, 0.0  ;;  %v1057_v31 = vmax.f32 %v1025_v17, 0.0 }
 0x11b   : > { %v1010_v22 = vadd.f32 %v1957_v57, %v971_v18  ;;  %v1026_v23 = vadd.f32 %v1957_v57, %v987_v19  ;;  %v1619_v24 = vpop.f32.mrb[17].mxu0  ;;  %v1667_v25 = vpop.f32.mrb[17].mxu1 }
 0x11c   : > { %v1620_v26 = vadd.f32 %v1619_v24, %v1618_v20  ;;  %v1668_v27 = vadd.f32 %v1667_v25, %v1666_v21  ;;  %v1621_v28 = vpop.f32.mrb[18].mxu0  ;;  %v1669_v29 = vpop.f32.mrb[18].mxu1 }
 0x11d   : > { %v1042_v32 = vmax.f32 %v1010_v22, 0.0  ;;  %v1058_v33 = vmax.f32 %v1026_v23, 0.0  ;;  %v1622_v34 = vpop.f32.mrb[19].mxu0  ;;  %v1670_v35 = vpop.f32.mrb[19].mxu1 }
 0x11e   : > { %v972_v36 = vmul.f32 %v1620_v26, %v1952_v51  ;;  %v988_v37 = vmul.f32 %v1668_v27, %v1952_v51  ;;  %v1623_v38 = vadd.f32 %v1622_v34, %v1621_v28  ;;  %v1671_v39 = vadd.f32 %v1670_v35, %v1669_v29 }
 0x11f   : > { %v1501_v40 = vpack.c.bf16 %v1042_v32, %v1041_v30  ;;  %v1541_v41 = vpack.c.bf16 %v1058_v33, %v1057_v31 }
 0x120   : > { %v1011_v42 = vadd.f32 %v1957_v57, %v972_v36  ;;  %v1027_v43 = vadd.f32 %v1957_v57, %v988_v37  ;;  %v973_v44 = vmul.f32 %v1623_v38, %v1952_v51  ;;  %v989_v45 = vmul.f32 %v1671_v39, %v1952_v51 }
 0x121   : > { %1565 = vst [vmem:[%s1971_s21 + $0x18] sm:$0xff] %v1501_v40   ;;  %1573 = vst [vmem:[%s1971_s21 + $0x58] sm:$0xff] %v1541_v41  }
 0x122   : > { %v1012_v46 = vadd.f32 %v1957_v57, %v973_v44  ;;  %v1028_v47 = vadd.f32 %v1957_v57, %v989_v45  ;;  %v1624_v48 = vpop.f32.mrb[20].mxu0  ;;  %v1672_v49 = vpop.f32.mrb[20].mxu1  ;;  %v1043_v50 = vmax.f32 %v1011_v42, 0.0  ;;  %v1059_v52 = vmax.f32 %v1027_v43, 0.0 }
 0x123   : > { %v1625_v53 = vpop.f32.mrb[21].mxu0  ;;  %v1673_v54 = vpop.f32.mrb[21].mxu1 }
 0x124   : > { %v1044_v55 = vmax.f32 %v1012_v46, 0.0  ;;  %v1060_v56 = vmax.f32 %v1028_v47, 0.0  ;;  %v1626_v58 = vadd.f32 %v1625_v53, %v1624_v48  ;;  %v1674_v59 = vadd.f32 %v1673_v54, %v1672_v49  ;;  %v1627_v60 = vpop.f32.mrb[22].mxu0  ;;  %v1675_v61 = vpop.f32.mrb[22].mxu1 }
 0x125   : > { %v1628_v62 = vpop.f32.mrb[23].mxu0  ;;  %v1676_v63 = vpop.f32.mrb[23].mxu1 }
 0x126   : > { %v1506_v0 = vpack.c.bf16 %v1044_v55, %v1043_v50  ;;  %v1546_v1 = vpack.c.bf16 %v1060_v56, %v1059_v52  ;;  %v974_v2 = vmul.f32 %v1626_v58, %v1952_v51  ;;  %v990_v3 = vmul.f32 %v1674_v59, %v1952_v51 }
 0x127   : > { %v1629_v4 = vadd.f32 %v1628_v62, %v1627_v60  ;;  %v1677_v5 = vadd.f32 %v1676_v63, %v1675_v61 }
 0x128   : > { %1566 = vst [vmem:[%s1971_s21 + $0x20] sm:$0xff] %v1506_v0   ;;  %1574 = vst [vmem:[%s1971_s21 + $0x60] sm:$0xff] %v1546_v1   ;;  %v1013_v6 = vadd.f32 %v1957_v57, %v974_v2  ;;  %v1029_v7 = vadd.f32 %v1957_v57, %v990_v3 }
 0x129   : > { %v975_v8 = vmul.f32 %v1629_v4, %v1952_v51  ;;  %v991_v9 = vmul.f32 %v1677_v5, %v1952_v51 }
 0x12a   : > { %v1630_v10 = vpop.f32.mrb[24].mxu0  ;;  %v1678_v11 = vpop.f32.mrb[24].mxu1  ;;  %v1045_v20 = vmax.f32 %v1013_v6, 0.0  ;;  %v1061_v21 = vmax.f32 %v1029_v7, 0.0 }
 0x12b   : > { %v1014_v12 = vadd.f32 %v1957_v57, %v975_v8  ;;  %v1030_v13 = vadd.f32 %v1957_v57, %v991_v9  ;;  %v1631_v14 = vpop.f32.mrb[25].mxu0  ;;  %v1679_v15 = vpop.f32.mrb[25].mxu1 }
 0x12c   : > { %v1632_v16 = vadd.f32 %v1631_v14, %v1630_v10  ;;  %v1680_v17 = vadd.f32 %v1679_v15, %v1678_v11  ;;  %v1633_v18 = vpop.f32.mrb[26].mxu0  ;;  %v1681_v19 = vpop.f32.mrb[26].mxu1 }
 0x12d   : > { %v1046_v22 = vmax.f32 %v1014_v12, 0.0  ;;  %v1062_v23 = vmax.f32 %v1030_v13, 0.0  ;;  %v1634_v24 = vpop.f32.mrb[27].mxu0  ;;  %v1682_v25 = vpop.f32.mrb[27].mxu1 }
 0x12e   : > { %v976_v26 = vmul.f32 %v1632_v16, %v1952_v51  ;;  %v992_v27 = vmul.f32 %v1680_v17, %v1952_v51  ;;  %v1635_v28 = vadd.f32 %v1634_v24, %v1633_v18  ;;  %v1683_v29 = vadd.f32 %v1682_v25, %v1681_v19 }
 0x12f   : > { %v1511_v30 = vpack.c.bf16 %v1046_v22, %v1045_v20  ;;  %v1551_v31 = vpack.c.bf16 %v1062_v23, %v1061_v21 }
 0x130   : > { %v1015_v32 = vadd.f32 %v1957_v57, %v976_v26  ;;  %v1031_v33 = vadd.f32 %v1957_v57, %v992_v27  ;;  %v977_v34 = vmul.f32 %v1635_v28, %v1952_v51  ;;  %v993_v35 = vmul.f32 %v1683_v29, %v1952_v51 }
 0x131   : > { %1567 = vst [vmem:[%s1971_s21 + $0x28] sm:$0xff] %v1511_v30   ;;  %1575 = vst [vmem:[%s1971_s21 + $0x68] sm:$0xff] %v1551_v31  }
 0x132   : > { %v1016_v36 = vadd.f32 %v1957_v57, %v977_v34  ;;  %v1032_v37 = vadd.f32 %v1957_v57, %v993_v35  ;;  %v1636_v38 = vpop.f32.mrb[28].mxu0  ;;  %v1684_v39 = vpop.f32.mrb[28].mxu1  ;;  %v1047_v40 = vmax.f32 %v1015_v32, 0.0  ;;  %v1063_v41 = vmax.f32 %v1031_v33, 0.0 }
 0x133   : > { %v1637_v42 = vpop.f32.mrb[29].mxu0  ;;  %v1685_v43 = vpop.f32.mrb[29].mxu1 }
 0x134   : > { %v1048_v44 = vmax.f32 %v1016_v36, 0.0  ;;  %v1064_v45 = vmax.f32 %v1032_v37, 0.0  ;;  %v1638_v46 = vadd.f32 %v1637_v42, %v1636_v38  ;;  %v1686_v47 = vadd.f32 %v1685_v43, %v1684_v39  ;;  %v1639_v48 = vpop.f32.mrb[30].mxu0  ;;  %v1687_v49 = vpop.f32.mrb[30].mxu1 }
 0x135   : > { %v1640_v50 = vpop.f32.mrb[31].mxu0  ;;  %v1688_v52 = vpop.f32.mrb[31].mxu1 }
 0x136   : > { %v1516_v53 = vpack.c.bf16 %v1048_v44, %v1047_v40  ;;  %v1556_v54 = vpack.c.bf16 %v1064_v45, %v1063_v41  ;;  %v978_v55 = vmul.f32 %v1638_v46, %v1952_v51  ;;  %v994_v56 = vmul.f32 %v1686_v47, %v1952_v51 }
 0x137   : > { %v1641_v58 = vadd.f32 %v1640_v50, %v1639_v48  ;;  %v1689_v59 = vadd.f32 %v1688_v52, %v1687_v49 }
 0x138   : > { %1568 = vst [vmem:[%s1971_s21 + $0x30] sm:$0xff] %v1516_v53   ;;  %1576 = vst [vmem:[%s1971_s21 + $0x70] sm:$0xff] %v1556_v54   ;;  %v1017_v60 = vadd.f32 %v1957_v57, %v978_v55  ;;  %v1033_v61 = vadd.f32 %v1957_v57, %v994_v56 }
 0x139   : > { %v979_v62 = vmul.f32 %v1641_v58, %v1952_v51  ;;  %v995_v63 = vmul.f32 %v1689_v59, %v1952_v51 }
 0x13a   : > { %v1049_v2 = vmax.f32 %v1017_v60, 0.0  ;;  %v1065_v3 = vmax.f32 %v1033_v61, 0.0 }
 0x13b   : > { %v1018_v0 = vadd.f32 %v1957_v57, %v979_v62  ;;  %v1034_v1 = vadd.f32 %v1957_v57, %v995_v63 }
 0x13d   : > { %v1050_v4 = vmax.f32 %v1018_v0, 0.0  ;;  %v1066_v5 = vmax.f32 %v1034_v1, 0.0 }
 0x13f   : > { %v1521_v6 = vpack.c.bf16 %v1050_v4, %v1049_v2  ;;  %v1561_v7 = vpack.c.bf16 %v1066_v5, %v1065_v3 }
 0x141   : > { %1569 = vst [vmem:[%s1971_s21 + $0x38] sm:$0xff] %v1521_v6   ;;  %1577 = vst [vmem:[%s1971_s21 + $0x78] sm:$0xff] %v1561_v7  }
 0x142 PF: > { %s14_s17 = sadd.s32 1, %s1816_s17   ;;  %s2059_s15 = smov %s1812_s16 }
 0x143   : > { %p11_p5 = scmp.ge.s32.totalorder %s14_s17, 10   ;;  %s2060_s16 = smov %s2062_s18 }
 0x145   :  { %13 = sbr.rel (!%p11_p5) target bundleno = 2 (0x2), region = 83 }

</bundles_post_ra>
